<compile_context>
chip_gen: v5e
topology: v5e:2x2
jax: 0.10.0
libtpu: 0.0.40
codegen_flags: <defaults>
</compile_context>

<pallas_src>
import functools
import math

import jax
import jax.numpy as jnp
from jax import lax
from jax.experimental import pallas as pl
from jax.experimental.pallas import tpu as pltpu  # noqa: F401  (TPU backend)


# dot_general dimension_numbers for  A @ B^T  (contract the last dim of both).
_DN_NT = (((1,), (1,)), ((), ()))


def _mha_kernel(x_ref, wqkv_ref, wo_ref, bqkv_ref, bo_ref, o_ref, *,
                B, N, heads, d_k):
    M = heads * d_k
    BN = B * N
    tdk = 3 * d_k  # q|k|v block width per head in the fused projection output

    x = x_ref[...]                                            # (B*N, M)

    # ---- Fused Q/K/V projection: ONE MXU contraction + ONE bias add. --------
    # Output columns are ordered (head, {q,k,v}, d_k) by wrapper-side weight packing.
    qkv = lax.dot_general(x, wqkv_ref[...], _DN_NT,
                          preferred_element_type=jnp.float32) + bqkv_ref[...]

    # ---- Move heads to a single leading batch dim (g = h*B + b). ------------
    # `heads` contiguous 24-lane slices + one axis-0 concat + one leading/sublane
    # reshape — all previously-proven lowering patterns.
    hb = jnp.concatenate(
        [qkv[:, h * tdk:(h + 1) * tdk] for h in range(heads)], axis=0)
    hb = hb.reshape(heads * B, N, tdk)                        # (G, N, 3*d_k)

    q = hb[..., 0 * d_k:1 * d_k]                              # (G, N, d_k)
    k = hb[..., 1 * d_k:2 * d_k]
    v = hb[..., 2 * d_k:3 * d_k]

    # ---- Scaled dot-product attention, batched over all (head, batch). ------
    s = jnp.einsum("gnd,gmd->gnm", q, k,
                   preferred_element_type=jnp.float32) * (1.0 / math.sqrt(d_k))
    s = s - jnp.max(s, axis=-1, keepdims=True)
    e = jnp.exp(s)
    p = e / jnp.sum(e, axis=-1, keepdims=True)                # exact softmax
    o = jnp.einsum("gnm,gmd->gnd", p, v,
                   preferred_element_type=jnp.float32)        # (G, N, d_k)

    # ---- Reassemble heads onto lanes, then ONE output projection (K = M). ---
    o_cat = jnp.concatenate(
        [o[h * B:(h + 1) * B].reshape(BN, d_k) for h in range(heads)], axis=-1)
    y = lax.dot_general(o_cat, wo_ref[...], _DN_NT,
                        preferred_element_type=jnp.float32) + bo_ref[...]

    o_ref[...] = y.astype(o_ref.dtype)


def multihead_attention(x, wq, bq, wk, bk, wv, bv, wo, bo, *, heads):
    B, N, M = x.shape
    assert M % heads == 0
    d_k = M // heads
    BN = B * N

    # ---- Wrapper-side packing (free XLA layout plumbing). -------------------
    # Fused projection weight rows ordered (head, {q,k,v}, d_k) so that the kernel
    # can peel each head's q/k/v with a single contiguous lane slice.
    def pack_w(w):
        return w.reshape(heads, d_k, M)

    wqkv = jnp.stack([pack_w(wq), pack_w(wk), pack_w(wv)], axis=1).reshape(3 * M, M)
    bqkv = jnp.stack([bq.reshape(heads, d_k),
                      bk.reshape(heads, d_k),
                      bv.reshape(heads, d_k)], axis=1).reshape(1, 3 * M)

    kernel = functools.partial(_mha_kernel, B=B, N=N, heads=heads, d_k=d_k)

    # Advisory cost for XLA scheduling around this tiny custom call.
    flops = 2 * (BN * M * 3 * M            # fused QKV projection
                 + heads * B * N * N * d_k  # Q K^T
                 + heads * B * N * N * d_k  # P V
                 + BN * M * M)              # output projection
    transcendentals = heads * B * N * N     # exp in the softmax
    bytes_accessed = 4 * (BN * M + 3 * M * M + M * M + 3 * M + M + BN * M)

    # Single kernel invocation (no grid): everything fits easily in VMEM at these
    # sizes, so the fixed per-call/per-step overhead is paid exactly once and the
    # fused projection sees all B*N rows in one matmul.  The wrapper-side reshape
    # of x / the output is free layout plumbing in XLA.
    x2 = x.reshape(BN, M)
    y2 = pl.pallas_call(
        kernel,
        out_shape=jax.ShapeDtypeStruct((BN, M), x.dtype),
        cost_estimate=pl.CostEstimate(flops=flops,
                                      transcendentals=transcendentals,
                                      bytes_accessed=bytes_accessed),
    )(x2, wqkv, wo, bqkv, bo)
    return y2.reshape(B, N, M)


def mha_reference(x, wq, bq, wk, bk, wv, bv, wo, bo, *, heads):
    """Pure-JAX reference matching the PyTorch forward exactly."""
    B, N, M = x.shape
    d_k = M // heads
    q = x @ wq.T + bq[0]
    k = x @ wk.T + bk[0]
    v = x @ wv.T + bv[0]
    q = q.reshape(B, N, heads, d_k).transpose(0, 2, 1, 3)
    k = k.reshape(B, N, heads, d_k).transpose(0, 2, 1, 3)
    v = v.reshape(B, N, heads, d_k).transpose(0, 2, 1, 3)
    s = jnp.einsum("bhqd,bhkd->bhqk", q, k) / math.sqrt(d_k)
    p = jax.nn.softmax(s, axis=-1)
    o = jnp.einsum("bhqk,bhkd->bhqd", p, v)
    o = o.transpose(0, 2, 1, 3).reshape(B, N, M)
    return o @ wo.T + bo[0]


if __name__ == "__main__":
    B, N, M, heads = 2, 8, 32, 4

    key = jax.random.PRNGKey(0)
    keys = jax.random.split(key, 10)

    # Deterministic parameter init, mimicking nn.Linear's U(-1/sqrt(M), 1/sqrt(M))
    bound = 1.0 / math.sqrt(M)

    def u(k, shape):
        return jax.random.uniform(k, shape, jnp.float32, -bound, bound)

    x = jax.random.normal(keys[0], (B, N, M), jnp.float32)
    wq = u(keys[1], (M, M)); bq = u(keys[2], (1, M))
    wk = u(keys[3], (M, M)); bk = u(keys[4], (1, M))
    wv = u(keys[5], (M, M)); bv = u(keys[6], (1, M))
    wo = u(keys[7], (M, M)); bo = u(keys[8], (1, M))

    out = multihead_attention(x, wq, bq, wk, bk, wv, bv, wo, bo, heads=heads)
    out = jax.block_until_ready(out)

    ref = mha_reference(x, wq, bq, wk, bk, wv, bv, wo, bo, heads=heads)
    assert out.shape == (B, N, M)
    # f32 matmuls on the MXU (default precision) use bf16 passes, so allow a small
    # tolerance vs. the XLA reference; the softmax itself is exact in this kernel.
    assert jnp.allclose(out, ref, atol=2e-3, rtol=1e-3), "mismatch vs reference"

    print("KERNEL_OK")
</pallas_src>

<mosaic_0001>
module attributes {stable_mosaic.version = 11 : i64} {
  func.func @_mha_kernel(%arg0: memref<16x32xf32, #tpu.memory_space<vmem>>, %arg1: memref<96x32xf32, #tpu.memory_space<vmem>>, %arg2: memref<32x32xf32, #tpu.memory_space<vmem>>, %arg3: memref<1x96xf32, #tpu.memory_space<vmem>>, %arg4: memref<1x32xf32, #tpu.memory_space<vmem>>, %arg5: memref<16x32xf32, #tpu.memory_space<vmem>>) attributes {dimension_semantics = [], scalar_prefetch = 0 : i64, scratch_operands = 0 : i64, tpu.core_type = #tpu.core_type<tc>} {
    %c0 = arith.constant 0 : index
    %c0_0 = arith.constant 0 : index
    %0 = vector.load %arg0[%c0, %c0_0] : memref<16x32xf32, #tpu.memory_space<vmem>>, vector<16x32xf32>
    %c0_1 = arith.constant 0 : index
    %c0_2 = arith.constant 0 : index
    %1 = vector.load %arg1[%c0_1, %c0_2] : memref<96x32xf32, #tpu.memory_space<vmem>>, vector<96x32xf32>
    %cst = arith.constant dense<0.000000e+00> : vector<16x96xf32>
    %2 = tpu.matmul %0, %1, %cst {dimension_numbers = #tpu.dot_dimension_numbers<[1], [1], [0], [0], [0, 0, 1, 0], [], []>} : vector<16x32xf32>, vector<96x32xf32>, vector<16x96xf32> -> vector<16x96xf32>
    %c0_3 = arith.constant 0 : index
    %c0_4 = arith.constant 0 : index
    %3 = vector.load %arg3[%c0_3, %c0_4] : memref<1x96xf32, #tpu.memory_space<vmem>>, vector<1x96xf32>
    %4 = vector.broadcast %3 : vector<1x96xf32> to vector<16x96xf32>
    %5 = arith.addf %2, %4 : vector<16x96xf32>
    %6 = vector.extract_strided_slice %5 {offsets = [0, 0], sizes = [16, 24], strides = [1, 1]} : vector<16x96xf32> to vector<16x24xf32>
    %7 = vector.extract_strided_slice %5 {offsets = [0, 24], sizes = [16, 24], strides = [1, 1]} : vector<16x96xf32> to vector<16x24xf32>
    %8 = vector.extract_strided_slice %5 {offsets = [0, 48], sizes = [16, 24], strides = [1, 1]} : vector<16x96xf32> to vector<16x24xf32>
    %9 = vector.extract_strided_slice %5 {offsets = [0, 72], sizes = [16, 24], strides = [1, 1]} : vector<16x96xf32> to vector<16x24xf32>
    %10 = tpu.concatenate %6, %7, %8, %9 in 0 : vector<16x24xf32>, vector<16x24xf32>, vector<16x24xf32>, vector<16x24xf32> -> vector<64x24xf32>
    %11 = vector.shape_cast %10 : vector<64x24xf32> to vector<8x8x24xf32>
    %12 = vector.extract_strided_slice %11 {offsets = [0, 0, 0], sizes = [8, 8, 8], strides = [1, 1, 1]} : vector<8x8x24xf32> to vector<8x8x8xf32>
    %13 = vector.extract_strided_slice %11 {offsets = [0, 0, 8], sizes = [8, 8, 8], strides = [1, 1, 1]} : vector<8x8x24xf32> to vector<8x8x8xf32>
    %14 = vector.extract_strided_slice %11 {offsets = [0, 0, 16], sizes = [8, 8, 8], strides = [1, 1, 1]} : vector<8x8x24xf32> to vector<8x8x8xf32>
    "tpu.trace_start"() <{level = 10 : i32, message = "gnd,gmd->gnm"}> : () -> ()
    %cst_5 = arith.constant dense<0.000000e+00> : vector<8x8x8xf32>
    %15 = tpu.matmul %12, %13, %cst_5 {dimension_numbers = #tpu.dot_dimension_numbers<[2], [2], [1], [1], [0, 0, 0, 1, 1, 1], [0], [0]>} : vector<8x8x8xf32>, vector<8x8x8xf32>, vector<8x8x8xf32> -> vector<8x8x8xf32>
    "tpu.trace_stop"() : () -> ()
    %cst_6 = arith.constant 0.353553385 : f32
    %16 = vector.broadcast %cst_6 : f32 to vector<8x8x8xf32>
    %17 = arith.mulf %15, %16 : vector<8x8x8xf32>
    %cst_7 = arith.constant dense<0xFF800000> : vector<8x8xf32>
    %18 = vector.multi_reduction <maximumf>, %17, %cst_7 [2] : vector<8x8x8xf32> to vector<8x8xf32>
    %19 = vector.shape_cast %18 : vector<8x8xf32> to vector<8x8x1xf32>
    %20 = vector.broadcast %19 : vector<8x8x1xf32> to vector<8x8x8xf32>
    %21 = arith.subf %17, %20 : vector<8x8x8xf32>
    %22 = math.exp %21 : vector<8x8x8xf32>
    %cst_8 = arith.constant dense<0.000000e+00> : vector<8x8xf32>
    %23 = vector.multi_reduction <add>, %22, %cst_8 [2] : vector<8x8x8xf32> to vector<8x8xf32>
    %24 = vector.shape_cast %23 : vector<8x8xf32> to vector<8x8x1xf32>
    %25 = vector.broadcast %24 : vector<8x8x1xf32> to vector<8x8x8xf32>
    %26 = arith.divf %22, %25 : vector<8x8x8xf32>
    "tpu.trace_start"() <{level = 10 : i32, message = "gnm,gmd->gnd"}> : () -> ()
    %cst_9 = arith.constant dense<0.000000e+00> : vector<8x8x8xf32>
    %27 = tpu.matmul %26, %14, %cst_9 {dimension_numbers = #tpu.dot_dimension_numbers<[2], [1], [1], [2], [0, 0, 0, 1, 1, 2], [0], [0]>} : vector<8x8x8xf32>, vector<8x8x8xf32>, vector<8x8x8xf32> -> vector<8x8x8xf32>
    "tpu.trace_stop"() : () -> ()
    %28 = vector.extract_strided_slice %27 {offsets = [0, 0, 0], sizes = [2, 8, 8], strides = [1, 1, 1]} : vector<8x8x8xf32> to vector<2x8x8xf32>
    %29 = vector.shape_cast %28 : vector<2x8x8xf32> to vector<16x8xf32>
    %30 = vector.extract_strided_slice %27 {offsets = [2, 0, 0], sizes = [2, 8, 8], strides = [1, 1, 1]} : vector<8x8x8xf32> to vector<2x8x8xf32>
    %31 = vector.shape_cast %30 : vector<2x8x8xf32> to vector<16x8xf32>
    %32 = vector.extract_strided_slice %27 {offsets = [4, 0, 0], sizes = [2, 8, 8], strides = [1, 1, 1]} : vector<8x8x8xf32> to vector<2x8x8xf32>
    %33 = vector.shape_cast %32 : vector<2x8x8xf32> to vector<16x8xf32>
    %34 = vector.extract_strided_slice %27 {offsets = [6, 0, 0], sizes = [2, 8, 8], strides = [1, 1, 1]} : vector<8x8x8xf32> to vector<2x8x8xf32>
    %35 = vector.shape_cast %34 : vector<2x8x8xf32> to vector<16x8xf32>
    %36 = tpu.concatenate %29, %31, %33, %35 in 1 : vector<16x8xf32>, vector<16x8xf32>, vector<16x8xf32>, vector<16x8xf32> -> vector<16x32xf32>
    %c0_10 = arith.constant 0 : index
    %c0_11 = arith.constant 0 : index
    %37 = vector.load %arg2[%c0_10, %c0_11] : memref<32x32xf32, #tpu.memory_space<vmem>>, vector<32x32xf32>
    %cst_12 = arith.constant dense<0.000000e+00> : vector<16x32xf32>
    %38 = tpu.matmul %36, %37, %cst_12 {dimension_numbers = #tpu.dot_dimension_numbers<[1], [1], [0], [0], [0, 0, 1, 0], [], []>} : vector<16x32xf32>, vector<32x32xf32>, vector<16x32xf32> -> vector<16x32xf32>
    %c0_13 = arith.constant 0 : index
    %c0_14 = arith.constant 0 : index
    %39 = vector.load %arg4[%c0_13, %c0_14] : memref<1x32xf32, #tpu.memory_space<vmem>>, vector<1x32xf32>
    %40 = vector.broadcast %39 : vector<1x32xf32> to vector<16x32xf32>
    %41 = arith.addf %38, %40 : vector<16x32xf32>
    %c0_15 = arith.constant 0 : index
    %c0_16 = arith.constant 0 : index
    %42 = vector.load %arg5[%c0_15, %c0_16] : memref<16x32xf32, #tpu.memory_space<vmem>>, vector<16x32xf32>
    tpu.vector_store %arg5[%c0_15, %c0_16], %41 {strides = array<i32>} : memref<16x32xf32, #tpu.memory_space<vmem>>, vector<16x32xf32>,
    return
  }
}

</mosaic_0001>

<bundles_post_ra>
// kernel: tpu_custom_call.1
= control target key start
LH: loop header
LB: loop body
LE: loop exit
PB: predicated region body
PF: predicated region fallthrough
CT: control target
= control target key end

     0   :  { %vm39_vm0 = vcmask 261120   ;;  %s1294_s0 = inlined_call_operand.vmem [shape: f32[16,32], index: 0, kind: input, shape index: {}]   ;;  %s1295_s1 = inlined_call_operand.vmem [shape: f32[96,32], index: 1, kind: input, shape index: {}]   ;;  %s1296_s2 = inlined_call_operand.vmem [shape: f32[32,32], index: 2, kind: input, shape index: {}]   ;;  %s1297_s3 = inlined_call_operand.vmem [shape: f32[1,96], index: 3, kind: input, shape index: {}]   ;;  %s1298_s4 = inlined_call_operand.vmem [shape: f32[1,32], index: 4, kind: input, shape index: {}]   ;;  %s1299_s5 = inlined_call_operand.hbm [shape: f32[16,32], index: 5, kind: output, shape index: {}]  }
   0x1   :  { %v34_v0 = vld [vmem:[%s1295_s1 + $0x58] sm:$0xff]  ;;  %v33_v1 = vld [vmem:[%s1295_s1 + $0x50] sm:$0xff] }
   0x2   :  { %837 = vmatpush.xpose.msk.msra.mxu0 %vm39_vm0, %v34_v0 }
   0x3   :  { %10 = vsyncpa [#allocation3], 0  ;;  %v32_v2 = vld [vmem:[%s1295_s1 + $0x48] sm:$0xff]  ;;  %v31_v3 = vld [vmem:[%s1295_s1 + $0x40] sm:$0xff]  ;;  %s967_s23 = smov 104   ;;  %vm121_vm1 = vcmask 64512  }
   0x4   :  { %v30_v4 = vld [vmem:[%s1295_s1 + $0x38] sm:$0xff]  ;;  %v29_v5 = vld [vmem:[%s1295_s1 + $0x30] sm:$0xff]  ;;  %v28_v6 = vld [vmem:[%s1295_s1 + $0x28] sm:$0xff]  ;;  %s970_s24 = smov 112   ;;  %s971_s25 = smov 24  }
   0x5   :  { %v27_v7 = vld [vmem:[%s1295_s1 + $0x20] sm:$0xff]  ;;  %v26_v8 = vld [vmem:[%s1295_s1 + $0x18] sm:$0xff]  ;;  %v25_v9 = vld [vmem:[%s1295_s1 + $0x10] sm:$0xff]  ;;  %s972_s26 = smov 8   ;;  %s973_s27 = smov 16  }
   0x6   :  { %838 = vmatpush.xpose.msk.msra.mxu0 %vm39_vm0, %v33_v1  ;;  %v24_v10 = vld [vmem:[%s1295_s1 + $0x8] sm:$0xff]  ;;  %v23_v11 = vld [vmem:[%s1295_s1] sm:$0xff]  ;;  %s966_s1 = smov 80   ;;  %s974_s12 = smov [#allocation2]  }
   0x7   :  { %v21_v12 = vld [vmem:[%s1294_s0] sm:$0xff]  ;;  %v22_v13 = vld [vmem:[%s1294_s0 + $0x8] sm:$0xff]  ;;  %s968_s0 = smov 56   ;;  %s823_s13 = sshll.u32 %s974_s12, 4  ;;  %s824_s13 = int_to_ptr.vmem [resolvable:$true] %s823_s13 }
   0x8   :  { %v906_v14 = vld [vmem:[%s1297_s3] ss:$0 sm:$0xff]  ;;  %s969_s3 = smov 120   ;;  %s825_s16 = sshll.u32 %s1299_s5, 4  ;;  %s826_s16 = int_to_ptr.hbm [resolvable:$true] %s825_s16 }
   0x9   :  { %s975_s17 = smov 128  }
   0xa   :  { %839 = vmatpush.xpose.msk.msra.mxu0 %vm39_vm0, %v32_v2 }
   0xe   :  { %840 = vmatpush.xpose.msk.msra.mxu0 %vm39_vm0, %v31_v3 }
  0x12   :  { %841 = vmatpush.xpose.msk.msra.mxu0 %vm39_vm0, %v30_v4 }
  0x16   :  { %842 = vmatpush.xpose.msk.msra.mxu0 %vm39_vm0, %v29_v5 }
  0x1a   :  { %843 = vmatpush.xpose.msk.msra.mxu0 %vm39_vm0, %v28_v6 }
  0x1e   :  { %844 = vmatpush.xpose.msk.msra.mxu0 %vm39_vm0, %v27_v7 }
  0x22   :  { %845 = vmatpush.xpose.msk.msra.mxu0 %vm39_vm0, %v26_v8 }
  0x26   :  { %846 = vmatpush.xpose.msk.msra.mxu0 %vm39_vm0, %v25_v9 }
  0x2a   :  { %847 = vmatpush.xpose.msk.msra.mxu0 %vm39_vm0, %v24_v10 }
  0x2e   :  { %848 = vmatpush.xpose.msk.msra.mxu0 %vm39_vm0, %v23_v11 }
  0x31   :  { %849 = vmatmul.msk.f32.vlgmr.msra.gmra.mxu0 %vm39_vm0, %v21_v12 }
  0x39   :  { %850 = vmatmul.msk.f32.gmra.mxu0 %vm39_vm0, %v22_v13 }
  0xae   :  { %v99_v15 = vpop.f32.mrf.mxu0 }
  0xaf   :  { %v1065_v16 = vadd.f32 %v906_v14, %v99_v15 }
  0xb1   :  { %111 = vrot.lane.b32.xlu1 %v1065_v16, %s966_s1  ;;  %107 = vrot.lane.b32.xlu0 %v1065_v16, %s967_s23 }
  0xb6   :  { %v102_v17 = vpop.f32.mrf.mxu0 }
  0xb7   :  { %v1069_v18 = vadd.f32 %v906_v14, %v102_v17 }
  0xb9   :  { %113 = vrot.lane.b32.xlu2 %v1069_v18, %s966_s1  ;;  %115 = vrot.lane.b32.xlu1 %v1065_v16, %s968_s0 }
  0xba   :  { %109 = vrot.lane.b32.xlu0 %v1069_v18, %s967_s23 }
  0xc1   :  { %117 = vrot.lane.b32.xlu2 %v1069_v18, %s968_s0  ;;  %146 = vrot.lane.b32.xlu1 %v1069_v18, %s969_s3 }
  0xc2   :  { %119 = vrot.lane.b32.xlu0 %v1065_v16, %s969_s3 }
 0x113   :  { %v1077_v19 = vpop.permute.xlu2 %113 }
 0x11b   :  { %v1085_v22 = vpop.permute.xlu2 %117 }
 0x123   :  { %v1079_v20 = vpop.permute.xlu1 %111  ;;  %v1081_v21 = vpop.permute.xlu0 %107 }
 0x124   :  { %224 = vrot.lane.b32.xlu1 %v1079_v20, %s969_s3  ;;  %172 = vrot.lane.b32.xlu2 %v1081_v21, %s969_s3  ;;  %v901_v8 = vpack.i.bf16 %v1077_v19, %v1079_v20 }
 0x12b   :  { %v1087_v23 = vpop.permute.xlu1 %115 }
 0x12c   :  { %v1089_v24 = vpop.permute.xlu0 %109  ;;  %302 = vrot.lane.b32.xlu1 %v1085_v22, %s969_s3  ;;  %276 = vrot.lane.b32.xlu2 %v1087_v23, %s969_s3 }
 0x12d   :  { %198 = vrot.lane.b32.xlu0 %v1089_v24, %s969_s3  ;;  %v891_v62 = vpack.i.bf16 %v1089_v24, %v1065_v16 }
 0x133   :  { %v147_v25 = vpop.permute.xlu1 %146 }
 0x134   :  { %v120_v26 = vpop.permute.xlu0 %119  ;;  %853 = vmatpush.xpose.msk.msra.mxu3 %vm121_vm1, %v147_v25 }
 0x135   :  { %250 = vrot.lane.b32.xlu0 %v1077_v19, %s969_s3  ;;  %851 = vmatpush.xpose.msk.msra.mxu1 %vm121_vm1, %v120_v26 }
 0x137   :  { %854 = vmatmul.msk.f32.vlgmr.msra.gmra.mxu3 %vm121_vm1, %v1069_v18 }
 0x138   :  { %852 = vmatmul.msk.f32.vlgmr.msra.gmra.mxu1 %vm121_vm1, %v1065_v16 }
 0x17e   :  { %v173_v27 = vpop.permute.xlu2 %172 }
 0x17f   :  { %855 = vmatpush.xpose.msk.msrb.mxu3 %vm121_vm1, %v173_v27 }
 0x182   :  { %856 = vmatmul.msk.f32.vlgmr.msrb.gmra.mxu3 %vm121_vm1, %v1081_v21 }
 0x186   :  { %v277_v31 = vpop.permute.xlu2 %276 }
 0x196   :  { %v225_v28 = vpop.permute.xlu1 %224 }
 0x197   :  { %859 = vmatpush.xpose.msk.msra.mxu2 %vm121_vm1, %v225_v28 }
 0x19a   :  { %860 = vmatmul.msk.f32.vlgmr.msra.gmra.mxu2 %vm121_vm1, %v1079_v20 }
 0x19e   :  { %v303_v29 = vpop.permute.xlu1 %302 }
 0x19f   :  { %v199_v30 = vpop.permute.xlu0 %198  ;;  %865 = vmatpush.xpose.msk.msrb.mxu2 %vm121_vm1, %v303_v29 }
 0x1a0   :  { %857 = vmatpush.xpose.msk.msrb.mxu1 %vm121_vm1, %v199_v30 }
 0x1a2   :  { %866 = vmatmul.msk.f32.vlgmr.msrb.gmra.mxu2 %vm121_vm1, %v1085_v22 }
 0x1a3   :  { %858 = vmatmul.msk.f32.vlgmr.msrb.gmra.mxu1 %vm121_vm1, %v1089_v24 }
 0x1a4   :  { %863 = vmatpush.xpose.msk.msra.mxu1 %vm121_vm1, %v277_v31 }
 0x1a7   :  { %v251_v32 = vpop.permute.xlu0 %250 }
 0x1a8   :  { %861 = vmatpush.xpose.msk.msra.mxu3 %vm121_vm1, %v251_v32 }
 0x1ab   :  { %862 = vmatmul.msk.f32.vlgmr.msra.gmra.mxu3 %vm121_vm1, %v1077_v19  ;;  %864 = vmatmul.msk.f32.vlgmr.msra.gmra.mxu1 %vm121_vm1, %v1087_v23 }
 0x1b5   :  { %v143_v33 = vpop.f32.mrf.mxu1 }
 0x1b6   :  { %v328_v34 = vmul.f32 0.35355338, %v143_v33 }
 0x1b8   :  { %v336_v35 = vsel %vm121_vm1, %v328_v34, -inf }
 0x1b9   :  { %337 = vmax.xlane.f32.xlu2 %v336_v35 }
 0x1ba   :  { %v169_v36 = vpop.f32.mrf.mxu3 }
 0x1bb   :  { %v329_v37 = vmul.f32 0.35355338, %v169_v36 }
 0x1bd   :  { %v339_v38 = vsel %vm121_vm1, %v329_v37, -inf }
 0x1be   :  { %340 = vmax.xlane.f32.xlu1 %v339_v38 }
 0x205   :  { %v195_v39 = vpop.f32.mrf.mxu3 }
 0x206   :  { %v330_v40 = vmul.f32 0.35355338, %v195_v39 }
 0x208   :  { %v342_v41 = vsel %vm121_vm1, %v330_v40, -inf }
 0x209   :  { %343 = vmax.xlane.f32.xlu2 %v342_v41 }
 0x21d   :  { %v247_v42 = vpop.f32.mrf.mxu2 }
 0x21e   :  { %v332_v48 = vmul.f32 0.35355338, %v247_v42 }
 0x220   :  { %v221_v43 = vpop.f32.mrf.mxu1  ;;  %v348_v51 = vsel %vm121_vm1, %v332_v48, -inf }
 0x221   :  { %v331_v44 = vmul.f32 0.35355338, %v221_v43 }
 0x223   :  { %v345_v45 = vsel %vm121_vm1, %v331_v44, -inf }
 0x224   :  { %346 = vmax.xlane.f32.xlu0 %v345_v45 }
 0x225   :  { %v325_v46 = vpop.f32.mrf.mxu2 }
 0x226   :  { %v335_v47 = vmul.f32 0.35355338, %v325_v46 }
 0x228   :  { %v357_v49 = vsel %vm121_vm1, %v335_v47, -inf  ;;  %v299_v50 = vpop.f32.mrf.mxu1 }
 0x229   :  { %358 = vmax.xlane.f32.xlu2 %v357_v49  ;;  %v334_v52 = vmul.f32 0.35355338, %v299_v50 }
 0x22b   :  { %v354_v58 = vsel %vm121_vm1, %v334_v52, -inf }
 0x22c   :  { %v338_v53 = vpop.xlane.xlu2 %337  ;;  %349 = vmax.xlane.f32.xlu0 %v348_v51 }
 0x22d   :  { %v360_v54 = vsub.f32 %v328_v34, %v338_v53  ;;  %v896_v53 = vpack.i.bf16 %v1081_v21, %v1069_v18 }
 0x22e   :  { %v273_v55 = vpop.f32.mrf.mxu3 }
 0x22f   :  { %v368_v56 = vmul.f32 1.442695, %v360_v54  ;;  %v333_v57 = vmul.f32 0.35355338, %v273_v55 }
 0x231   :  { %908 = vpow2.f32 %v368_v56  ;;  %355 = vmax.xlane.f32.xlu2 %v354_v58  ;;  %v351_v59 = vsel %vm121_vm1, %v333_v57, -inf  ;;  %v341_v63 = vpop.xlane.xlu1 %340 }
 0x232   :  { %352 = vmax.xlane.f32.xlu1 %v351_v59  ;;  %v361_v0 = vsub.f32 %v329_v37, %v341_v63 }
 0x234   :  { %v370_v1 = vmul.f32 1.442695, %v361_v0 }
 0x236   :  { %910 = vpow2.f32 %v370_v1 }
 0x237   :  { %v1127_v60 = vpop.eup %908 }
 0x238   :  { %v384_v61 = vsel %vm121_vm1, %v1127_v60, 0.0 }
 0x239   :  { %385 = vadd.xlane.f32.xlu0 %v384_v61 }
 0x23c   :  { %v1134_v2 = vpop.eup %910 }
 0x23d   :  { %v387_v3 = vsel %vm121_vm1, %v1134_v2, 0.0 }
 0x249   :  { %892 = vrot.lane.b32.xlu2 %v891_v62, %s970_s24 }
 0x272   :  { %388 = vadd.xlane.f32.xlu2 %v387_v3 }
 0x27c   :  { %v344_v4 = vpop.xlane.xlu2 %343 }
 0x27d   :  { %v362_v5 = vsub.f32 %v330_v40, %v344_v4 }
 0x27f   :  { %v372_v6 = vmul.f32 1.442695, %v362_v5 }
 0x281   :  { %912 = vpow2.f32 %v372_v6 }
 0x287   :  { %v1138_v7 = vpop.eup %912 }
 0x288   :  { %v390_v9 = vsel %vm121_vm1, %v1138_v7, 0.0 }
 0x289   :  { %391 = vadd.xlane.f32.xlu0 %v390_v9 }
 0x28a   :  { %902 = vrot.lane.b32.xlu2 %v901_v8, %s970_s24 }
 0x292   :  { %710 = vrot.lane.b32.xlu2 %v1085_v22, %s970_s24 }
 0x297   :  { %v347_v10 = vpop.xlane.xlu0 %346 }
 0x298   :  { %v363_v11 = vsub.f32 %v331_v44, %v347_v10 }
 0x29a   :  { %v374_v12 = vmul.f32 1.442695, %v363_v11 }
 0x29c   :  { %914 = vpow2.f32 %v374_v12  ;;  %v359_v13 = vpop.xlane.xlu2 %358 }
 0x29d   :  { %v367_v16 = vsub.f32 %v335_v47, %v359_v13 }
 0x29f   :  { %v350_v14 = vpop.xlane.xlu0 %349  ;;  %v382_v25 = vmul.f32 1.442695, %v367_v16 }
 0x2a0   :  { %v364_v15 = vsub.f32 %v332_v48, %v350_v14 }
 0x2a2   :  { %v1147_v17 = vpop.eup %914  ;;  %v376_v19 = vmul.f32 1.442695, %v364_v15 }
 0x2a3   :  { %v393_v20 = vsel %vm121_vm1, %v1147_v17, 0.0 }
 0x2a4   :  { %916 = vpow2.f32 %v376_v19  ;;  %394 = vadd.xlane.f32.xlu1 %v393_v20  ;;  %v356_v24 = vpop.xlane.xlu2 %355 }
 0x2a5   :  { %v353_v26 = vpop.xlane.xlu1 %352  ;;  %v366_v27 = vsub.f32 %v334_v52, %v356_v24  ;;  %918 = vpow2.f32 %v382_v25 }
 0x2a6   :  { %v365_v22 = vsub.f32 %v333_v57, %v353_v26 }
 0x2a7   :  { %v380_v31 = vmul.f32 1.442695, %v366_v27 }
 0x2a8   :  { %v378_v28 = vmul.f32 1.442695, %v365_v22 }
 0x2aa   :  { %v1151_v29 = vpop.eup %916  ;;  %920 = vpow2.f32 %v378_v28 }
 0x2ab   :  { %v396_v30 = vsel %vm121_vm1, %v1151_v29, 0.0  ;;  %v1155_v36 = vpop.eup %918 }
 0x2ac   :  { %397 = vadd.xlane.f32.xlu0 %v396_v30  ;;  %v386_v32 = vpop.xlane.xlu0 %385  ;;  %v893_v33 = vpop.permute.xlu2 %892  ;;  %v405_v40 = vsel %vm121_vm1, %v1155_v36, 0.0 }
 0x2ad   :  { %922 = vrcp.f32 %v386_v32  ;;  %v895_v34 = vunpack.i.h.bf16 %v893_v33  ;;  %v894_v35 = vunpack.i.l.bf16 %v893_v33  ;;  %v419_v44 = vand.u32 2147483648, %v386_v32 }
 0x2ae   :  { %924 = vpow2.f32 %v380_v31  ;;  %v417_v46 = vand.u32 2147483647, %v386_v32  ;;  %vm413_vm3 = vweird.f32 %v386_v32 }
 0x2af   :  { %549 = vmatpush.msrb.mxu3 %v894_v35  ;;  %v420_v49 = vor.u32 1.1754944e-38, %v419_v44 }
 0x2b0   :  { %v1157_v37 = vpop.eup %920  ;;  %vm418_vm5 = vcmp.eq.f32.partialorder %v417_v46, 8.507059e+37 }
 0x2b1   :  { %627 = vmatpush.msra.mxu3 %v895_v34  ;;  %v399_v38 = vsel %vm121_vm1, %v1157_v37, 0.0 }
 0x2b2   :  { %400 = vadd.xlane.f32.xlu1 %v399_v38 }
 0x2b3   :  { %v923_v39 = vpop.eup %922 }
 0x2b4   :  { %v409_v41 = vmul.f32 %v923_v39, %v386_v32  ;;  %406 = vadd.xlane.f32.xlu0 %v405_v40  ;;  %v1163_v42 = vpop.eup %924  ;;  %vm414_vm2 = vweird.f32 %v923_v39 }
 0x2b5   :  { %v402_v47 = vsel %vm121_vm1, %v1163_v42, 0.0  ;;  %vm415_vm4 = vmor %vm413_vm3, %vm414_vm2 }
 0x2b6   :  { %v410_v43 = vsub.f32 1.0, %v409_v41 }
 0x2b8   :  { %v411_v45 = vmul.f32 %v923_v39, %v410_v43 }
 0x2ba   :  { %v412_v48 = vadd.f32 %v923_v39, %v411_v45  ;;  %403 = vadd.xlane.f32.xlu1 %v402_v47 }
 0x2bc   :  { %v416_v50 = vsel %vm415_vm4, %v923_v39, %v412_v48 }
 0x2bd   :  { %v421_v51 = vsel %vm418_vm5, %v420_v49, %v416_v50 }
 0x2be   :  { %v422_v52 = vmul.f32 %v1127_v60, %v421_v51 }
 0x2c0   :  { %867 = vmatmul.msk.f32.vlgmr.msrb.gmra.mxu3 %vm121_vm1, %v422_v52 }
 0x2c8   :  { %684 = vrot.lane.b32.xlu0 %v1087_v23, %s970_s24 }
 0x2d3   :  { %897 = vrot.lane.b32.xlu1 %v896_v53, %s970_s24 }
 0x2e5   :  { %v1174_v56 = vpop.xlane.xlu2 %388 }
 0x2e6   :  { %vm428_vm12 = vweird.f32 %v1174_v56  ;;  %v434_v30 = vand.u32 2147483648, %v1174_v56  ;;  %v432_v33 = vand.u32 2147483647, %v1174_v56 }
 0x2e8   :  { %v435_v45 = vor.u32 1.1754944e-38, %v434_v30  ;;  %vm433_vm4 = vcmp.eq.f32.partialorder %v432_v33, 8.507059e+37  ;;  %v770_v33 = vld [vmem:[%s1296_s2 + $0x10] sm:$0xff] }
 0x2ed   :  { %v903_v51 = vpop.permute.xlu2 %902 }
 0x2fc   :  { %v1176_v58 = vpop.xlane.xlu0 %391 }
 0x2fd   :  { %v449_v46 = vand.u32 2147483648, %v1176_v58  ;;  %vm443_vm5 = vweird.f32 %v1176_v58  ;;  %v447_v48 = vand.u32 2147483647, %v1176_v58 }
 0x317   :  { %v395_v54 = vpop.xlane.xlu1 %394 }
 0x318   :  { %926 = vrcp.f32 %v395_v54  ;;  %v464_v60 = vand.u32 2147483648, %v395_v54  ;;  %v462_v23 = vand.u32 2147483647, %v395_v54  ;;  %vm458_vm7 = vweird.f32 %v395_v54 }
 0x319   :  { %928 = vrcp.f32 %v1174_v56 }
 0x31a   :  { %v465_v21 = vor.u32 1.1754944e-38, %v464_v60  ;;  %930 = vrcp.f32 %v1176_v58  ;;  %vm463_vm9 = vcmp.eq.f32.partialorder %v462_v23, 8.507059e+37 }
 0x31e   :  { %v927_v55 = vpop.eup %926 }
 0x31f   :  { %v454_v57 = vmul.f32 %v927_v55, %v395_v54  ;;  %vm459_vm6 = vweird.f32 %v927_v55  ;;  %v929_v0 = vpop.eup %928  ;;  %v1182_v3 = vpop.xlane.xlu0 %397 }
 0x320   :  { %vm460_vm8 = vmor %vm458_vm7, %vm459_vm6  ;;  %v424_v5 = vmul.f32 %v929_v0, %v1174_v56  ;;  %v931_v6 = vpop.eup %930  ;;  %vm429_vm10 = vweird.f32 %v929_v0  ;;  %v450_v56 = vor.u32 1.1754944e-38, %v449_v46  ;;  %vm448_vm7 = vcmp.eq.f32.partialorder %v447_v48, 8.507059e+37 }
 0x321   :  { %v455_v59 = vsub.f32 1.0, %v454_v57  ;;  %v439_v10 = vmul.f32 %v931_v6, %v1176_v58  ;;  %vm1203_vm13 = vmor %vm428_vm12, %vm429_vm10  ;;  %vm444_vm15 = vweird.f32 %v931_v6  ;;  %v479_v23 = vand.u32 2147483648, %v1182_v3 }
 0x322   :  { %v425_v9 = vsub.f32 1.0, %v424_v5  ;;  %vm445_vm6 = vmor %vm443_vm5, %vm444_vm15  ;;  %v905_v5 = vunpack.i.h.bf16 %v903_v51 }
 0x323   :  { %v456_v61 = vmul.f32 %v927_v55, %v455_v59  ;;  %v440_v14 = vsub.f32 1.0, %v439_v10  ;;  %v480_v10 = vor.u32 1.1754944e-38, %v479_v23 }
 0x324   :  { %v426_v12 = vmul.f32 %v929_v0, %v425_v9 }
 0x325   :  { %v457_v62 = vadd.f32 %v927_v55, %v456_v61  ;;  %v1179_v18 = vpop.xlane.xlu1 %400  ;;  %v441_v24 = vmul.f32 %v931_v6, %v440_v14 }
 0x326   :  { %v427_v19 = vadd.f32 %v929_v0, %v426_v12  ;;  %vm488_vm12 = vweird.f32 %v1179_v18 }
 0x327   :  { %v461_v63 = vsel %vm460_vm8, %v927_v55, %v457_v62  ;;  %v1190_v11 = vpop.xlane.xlu0 %406  ;;  %v442_v38 = vadd.f32 %v931_v6, %v441_v24  ;;  %vm473_vm8 = vweird.f32 %v1182_v3  ;;  %v494_v62 = vand.u32 2147483648, %v1179_v18 }
 0x328   :  { %v466_v1 = vsel %vm463_vm9, %v465_v21, %v461_v63  ;;  %v431_v35 = vsel %vm1203_vm13, %v929_v0, %v427_v19 }
 0x329   :  { %v467_v4 = vmul.f32 %v1147_v17, %v466_v1  ;;  %v436_v50 = vsel %vm433_vm4, %v435_v45, %v431_v35  ;;  %v446_v52 = vsel %vm445_vm6, %v931_v6, %v442_v38  ;;  %v492_v1 = vand.u32 2147483647, %v1179_v18  ;;  %v768_v35 = vld [vmem:[%s1296_s2] sm:$0xff] }
 0x32a   :  { %v451_v57 = vsel %vm448_vm7, %v450_v56, %v446_v52  ;;  %v904_v6 = vunpack.i.l.bf16 %v903_v51  ;;  %v495_v12 = vor.u32 1.1754944e-38, %v494_v62  ;;  %vm762_vm6 = vcmask 130048   ;;  %v907_v51 = vld [vmem:[%s1298_s4] ss:$0 sm:$0xff] }
 0x32b   :  { %870 = vmatmul.msk.f32.vlgmr.msra.gmra.mxu3 %vm121_vm1, %v467_v4  ;;  %v452_v4 = vmul.f32 %v1138_v7, %v451_v57  ;;  %v711_v7 = vpop.permute.xlu2 %710  ;;  %vm493_vm15 = vcmp.eq.f32.partialorder %v492_v1, 8.507059e+37  ;;  %vm765_vm7 = vcmask 195584  }
 0x32d   :  { %v404_v8 = vpop.xlane.xlu1 %403 }
 0x32e   :  { %932 = vrcp.f32 %v404_v8  ;;  %v509_v26 = vand.u32 2147483648, %v404_v8  ;;  %v507_v28 = vand.u32 2147483647, %v404_v8  ;;  %vm503_vm14 = vweird.f32 %v404_v8 }
 0x32f   :  { %934 = vrcp.f32 %v1182_v3 }
 0x330   :  { %936 = vrcp.f32 %v1179_v18  ;;  %v510_v39 = vor.u32 1.1754944e-38, %v509_v26  ;;  %vm508_vm3 = vcmp.eq.f32.partialorder %v507_v28, 8.507059e+37 }
 0x331   :  { %938 = vrcp.f32 %v1190_v11 }
 0x334   :  { %v933_v13 = vpop.eup %932 }
 0x335   :  { %v1192_v15 = vpop.eup %934  ;;  %v499_v16 = vmul.f32 %v933_v13, %v404_v8  ;;  %vm504_vm11 = vweird.f32 %v933_v13 }
 0x336   :  { %v1194_v17 = vpop.eup %936  ;;  %v469_v25 = vmul.f32 %v1192_v15, %v1182_v3  ;;  %vm505_vm2 = vmor %vm503_vm14, %vm504_vm11  ;;  %vm474_vm9 = vweird.f32 %v1192_v15 }
 0x337   :  { %v500_v20 = vsub.f32 1.0, %v499_v16  ;;  %v484_v22 = vmul.f32 %v1194_v17, %v1179_v18  ;;  %v1210_v44 = vpop.eup %938  ;;  %vm489_vm10 = vweird.f32 %v1194_v17  ;;  %vm1230_vm11 = vmor %vm473_vm8, %vm474_vm9  ;;  %v524_v16 = vand.u32 2147483648, %v1190_v11 }
 0x338   :  { %v470_v40 = vsub.f32 1.0, %v469_v25  ;;  %v514_v55 = vmul.f32 %v1210_v44, %v1190_v11  ;;  %vm1238_vm13 = vmor %vm488_vm12, %vm489_vm10 }
 0x339   :  { %v501_v27 = vmul.f32 %v933_v13, %v500_v20  ;;  %v485_v41 = vsub.f32 1.0, %v484_v22  ;;  %v525_v25 = vor.u32 1.1754944e-38, %v524_v16 }
 0x33a   :  { %v685_v31 = vpop.permute.xlu0 %684  ;;  %v471_v53 = vmul.f32 %v1192_v15, %v470_v40  ;;  %v515_v60 = vsub.f32 1.0, %v514_v55 }
 0x33b   :  { %v502_v34 = vadd.f32 %v933_v13, %v501_v27  ;;  %705 = vmatpush.msrb.mxu3 %v685_v31  ;;  %v486_v54 = vmul.f32 %v1194_v17, %v485_v41 }
 0x33c   :  { %v472_v58 = vadd.f32 %v1192_v15, %v471_v53  ;;  %v516_v18 = vmul.f32 %v1210_v44, %v515_v60 }
 0x33d   :  { %v506_v43 = vsel %vm505_vm2, %v933_v13, %v502_v34  ;;  %v487_v59 = vadd.f32 %v1194_v17, %v486_v54  ;;  %vm519_vm2 = vweird.f32 %v1210_v44  ;;  %v769_v34 = vld [vmem:[%s1296_s2 + $0x8] sm:$0xff] }
 0x33e   :  { %v511_v47 = vsel %vm508_vm3, %v510_v39, %v506_v43  ;;  %v476_v9 = vsel %vm1230_vm11, %v1192_v15, %v472_v58  ;;  %v517_v15 = vadd.f32 %v1210_v44, %v516_v18  ;;  %vm518_vm3 = vweird.f32 %v1190_v11 }
 0x33f   :  { %v512_v49 = vmul.f32 %v1163_v42, %v511_v47  ;;  %v437_v42 = vmul.f32 %v1134_v2, %v436_v50  ;;  %v477_v2 = vand.u32 2147483647, %v1182_v3  ;;  %v491_v3 = vsel %vm1238_vm13, %v1194_v17, %v487_v59  ;;  %vm520_vm4 = vmor %vm518_vm3, %vm519_vm2 }
 0x340   :  { %v496_v14 = vsel %vm493_vm15, %v495_v12, %v491_v3  ;;  %v522_v17 = vand.u32 2147483647, %v1190_v11  ;;  %v521_v24 = vsel %vm520_vm4, %v1210_v44, %v517_v15 }
 0x341   :  { %873 = vmatmul.msk.f32.vlgmr.msrb.gmra.mxu3 %vm121_vm1, %v512_v49  ;;  %vm478_vm14 = vcmp.eq.f32.partialorder %v477_v2, 8.507059e+37  ;;  %v497_v20 = vmul.f32 %v1157_v37, %v496_v14 }
 0x342   :  { %v481_v13 = vsel %vm478_vm14, %v480_v10, %v476_v9  ;;  %vm523_vm5 = vcmp.eq.f32.partialorder %v522_v17, 8.507059e+37 }
 0x343   :  { %v482_v19 = vmul.f32 %v1151_v29, %v481_v13  ;;  %v526_v26 = vsel %vm523_vm5, %v525_v25, %v521_v24  ;;  %v551_v27 = vpop.f32.mrf.mxu3 }
 0x344   :  { %v527_v22 = vmul.f32 %v1155_v36, %v526_v26  ;;  %v771_v36 = vld [vmem:[%s1296_s2 + $0x18] sm:$0xff] }
 0x345   :  { %v898_v61 = vpop.permute.xlu1 %897 }
 0x346   :  { %v900_v21 = vunpack.i.h.bf16 %v898_v61  ;;  %v899_v63 = vunpack.i.l.bf16 %v898_v61 }
 0x348   :  { %575 = vmatpush.msrb.mxu1 %v899_v63  ;;  %601 = vmatpush.msra.mxu2 %v900_v21 }
 0x349   :  { %868 = vmatmul.msk.f32.vlgmr.msrb.gmra.mxu1 %vm121_vm1, %v437_v42  ;;  %869 = vmatmul.msk.f32.vlgmr.msra.gmra.mxu2 %vm121_vm1, %v452_v4 }
 0x34a   :  { %653 = vmatpush.msra.mxu1 %v904_v6  ;;  %679 = vmatpush.msrb.mxu2 %v905_v5 }
 0x34c   :  { %731 = vmatpush.msrb.mxu1 %v711_v7  ;;  %875 = vmatpush.xpose.msk.msra.mxu2 %vm39_vm0, %v771_v36 }
 0x350   :  { %876 = vmatpush.xpose.msk.msra.mxu2 %vm39_vm0, %v770_v33 }
 0x351   :  { %871 = vmatmul.msk.f32.vlgmr.msra.gmra.mxu1 %vm121_vm1, %v482_v19  ;;  %872 = vmatmul.msk.f32.vlgmr.msrb.gmra.mxu2 %vm121_vm1, %v497_v20 }
 0x354   :  { %877 = vmatpush.xpose.msk.msra.mxu2 %vm39_vm0, %v769_v34 }
 0x358   :  { %878 = vmatpush.xpose.msk.msra.mxu2 %vm39_vm0, %v768_v35 }
 0x359   :  { %874 = vmatmul.msk.f32.vlgmr.msrb.gmra.mxu1 %vm121_vm1, %v527_v22 }
 0x3ae   :  { %v629_v11 = vpop.f32.mrf.mxu3 }
 0x3c4   :  { %v707_v28 = vpop.f32.mrf.mxu3 }
 0x3c5   :  { %754 = vrot.lane.b32.xlu2 %v707_v28, %s971_s25 }
 0x3c6   :  { %v577_v29 = vpop.f32.mrf.mxu1 }
 0x3cc   :  { %v603_v37 = vpop.f32.mrf.mxu2 }
 0x3cd   :  { %738 = vrot.lane.b32.xlu1 %v603_v37, %s972_s26 }
 0x3ce   :  { %v655_v30 = vpop.f32.mrf.mxu1 }
 0x3cf   :  { %746 = vrot.lane.b32.xlu0 %v655_v30, %s973_s27 }
 0x3d4   :  { %v681_v31 = vpop.f32.mrf.mxu2 }
 0x3d5   :  { %740 = vrot.lane.b32.xlu1 %v629_v11, %s972_s26 }
 0x3d6   :  { %v733_v32 = vpop.f32.mrf.mxu1 }
 0x3d7   :  { %748 = vrot.lane.b32.xlu0 %v681_v31, %s973_s27  ;;  %756 = vrot.lane.b32.xlu2 %v733_v32, %s971_s25 }
 0x41f   :  { %v755_v41 = vpop.permute.xlu2 %754 }
 0x431   :  { %v757_v48 = vpop.permute.xlu2 %756 }
 0x43f   :  { %v739_v38 = vpop.permute.xlu1 %738 }
 0x440   :  { %v760_v39 = vsel %vm121_vm1, %v551_v27, %v739_v38 }
 0x441   :  { %v747_v40 = vpop.permute.xlu0 %746 }
 0x442   :  { %v763_v43 = vsel %vm762_vm6, %v760_v39, %v747_v40 }
 0x443   :  { %v766_v44 = vsel %vm765_vm7, %v763_v43, %v755_v41 }
 0x444   :  { %879 = vmatmul.msk.f32.vlgmr.msra.gmra.mxu2 %vm39_vm0, %v766_v44 }
 0x447   :  { %v741_v45 = vpop.permute.xlu1 %740 }
 0x448   :  { %v761_v46 = vsel %vm121_vm1, %v577_v29, %v741_v45 }
 0x449   :  { %v749_v47 = vpop.permute.xlu0 %748 }
 0x44a   :  { %v764_v49 = vsel %vm762_vm6, %v761_v46, %v749_v47 }
 0x44b   :  { %v767_v50 = vsel %vm765_vm7, %v764_v49, %v757_v48 }
 0x44c   :  { %880 = vmatmul.msk.f32.gmra.mxu2 %vm39_vm0, %v767_v50 }
 0x4c7   :  { %v811_v52 = vpop.f32.mrf.mxu2 }
 0x4c8   :  { %v812_v53 = vadd.f32 %v907_v51, %v811_v52 }
 0x4ca   :  { %817 = vst.msk [vmem:[#allocation2] sm:$0xff] %vm39_vm0, %v812_v53 }
 0x4cf   :  { %v814_v54 = vpop.f32.mrf.mxu2 }
 0x4d0   :  { %v815_v55 = vadd.f32 %v907_v51, %v814_v54 }
 0x4d2   :  { %818 = vst.msk [vmem:[#allocation2 + $0x8] sm:$0xff] %vm39_vm0, %v815_v55 }
 0x4d3   :  { %831 = dma.vmem_to_hbm [thread:$0]  %s824_s13, 256, %s826_s16, [#allocation3], %s975_s17, %s975_s17, %s972_s26  }
 0x4d4   :  { %964 = dma.done.wait [#allocation3], 256  }
 0x4d5   :  { %965 = vsyncadd [#allocation3], 4294967040 }
 0x4d6   :  { %836 = vsyncpa [#allocation3], 1 }

</bundles_post_ra>
